<compile_context>
chip_gen: v6e
topology: v6e:2x2x1
jax: 0.10.0
libtpu: 0.0.40
codegen_flags: <defaults>
</compile_context>

<pallas_src>
import math

import jax
import jax.numpy as jnp
from jax.experimental import pallas as pl
from jax.experimental.pallas import tpu as pltpu


_INV_SQRT2 = 1.0 / math.sqrt(2.0)


def _mlp_kernel(x_ref, w1_ref, b1_ref, w2_ref, b2_ref, o_ref, acc_ref):
    """One (row-tile, hidden-slice) step of y = gelu(x@W1 + b1) @ W2 + b2."""
    k = pl.program_id(1)
    k_last = pl.num_programs(1) - 1

    @pl.when(k == 0)
    def _init():
        acc_ref[...] = jnp.zeros_like(acc_ref)

    # c_fc slice: (tm, C) @ (C, th) -> (tm, th).  Feed the MXU in bf16
    # (weights already bf16 from the wrapper), accumulate in f32.
    x = x_ref[...].astype(jnp.bfloat16)
    h = jnp.dot(x, w1_ref[...], preferred_element_type=jnp.float32)
    h = h + b1_ref[...].astype(jnp.float32)

    # Exact (erf) GELU in f32, matching torch.nn.GELU() default.
    h = 0.5 * h * (1.0 + jax.lax.erf(h * _INV_SQRT2))

    # c_proj partial: (tm, th) @ (th, C).
    partial = jnp.dot(h.astype(w2_ref.dtype), w2_ref[...],
                      preferred_element_type=jnp.float32)

    @pl.when(k != k_last)
    def _accum():
        acc_ref[...] += partial

    @pl.when(k == k_last)
    def _finalize():
        # Last slice fused: acc + partial + b2 in one pass (no extra RMW).
        y = acc_ref[...] + partial + b2_ref[...].astype(jnp.float32)
        # dropout: identity (p = 0.0 / eval mode).
        o_ref[...] = y.astype(o_ref.dtype)


def _round_up(a, b):
    return (a + b - 1) // b * b


def _pad_to(a, shape):
    pads = tuple((0, s - d) for d, s in zip(a.shape, shape))
    if all(p == (0, 0) for p in pads):
        return a
    return jnp.pad(a, pads)


def _vmem_footprint(tm, th, Cp, x_bytes, w_bytes, o_bytes):
    """Rough per-step VMEM bytes: double-buffered tiles + scratch + temporaries."""
    dbl = 2 * (tm * Cp * x_bytes          # x row tile
               + Cp * th * w_bytes        # W1 hidden slice
               + th * Cp * w_bytes        # W2 hidden slice
               + tm * Cp * o_bytes        # output tile
               + 8 * th * 4 + 8 * Cp * 4)  # b1 / b2 (sublane-padded)
    acc = tm * Cp * 4                     # f32 accumulator scratch
    tmp = tm * th * (4 + 2)               # f32 GELU temp + bf16 cast of h
    return dbl + acc + tmp


def mlp_pallas(x, w1, b1, w2, b2, *, tm=1024, th=1024,
               vmem_budget_bytes=40 * 1024 * 1024):
    """GPT MLP forward.  x: (..., C); w1: (C, H); b1: (H,); w2: (H, C); b2: (C,)."""
    orig_shape = x.shape
    C = orig_shape[-1]
    H = w1.shape[1]
    assert w1.shape == (C, H) and w2.shape == (H, C)
    assert b1.shape == (H,) and b2.shape == (C,)

    x2 = x.reshape(-1, C)
    M = x2.shape[0]

    # --- lane/sublane-friendly padding & tile selection ---------------------
    sub = 16 if x.dtype == jnp.bfloat16 else 8        # sublane packing
    Cp = _round_up(C, 128)                            # lane-dense feature dim
    Hp = _round_up(H, 128)                            # lane-dense hidden dim
    Mp0 = _round_up(M, sub)

    # Row tile: don't exceed the (sublane-padded) M, stay a sublane multiple.
    tm = min(tm, Mp0)
    tm = max(sub, (tm // sub) * sub)
    # Megacore clamp: keep >= 2 row tiles when there's enough work so the
    # "parallel" axis can shard across v7x's two TensorCores.
    if Mp0 >= 2 * sub and tm >= Mp0:
        tm = max(sub, _round_up((Mp0 + 1) // 2, sub))

    # Hidden slice candidates (divide Hp, <= requested th).
    th_req = min(th, Hp)
    th_cands = [c for c in (1024, 512, 256, 128) if c <= th_req and Hp % c == 0]
    if not th_cands:
        th_cands = [Hp]

    x_bytes = jnp.dtype(x.dtype).itemsize
    w_bytes = jnp.dtype(jnp.bfloat16).itemsize
    o_bytes = x_bytes

    # Shrink (th first, then tm) until the tile footprint fits the VMEM budget.
    tm_sel = th_sel = None
    tm_try = tm
    while tm_sel is None:
        for cand in th_cands:
            if _vmem_footprint(tm_try, cand, Cp, x_bytes, w_bytes,
                               o_bytes) <= vmem_budget_bytes:
                tm_sel, th_sel = tm_try, cand
                break
        if tm_sel is None:
            if tm_try <= sub:
                tm_sel, th_sel = tm_try, th_cands[-1]   # best effort
            else:
                tm_try = max(sub, (tm_try // 2 // sub) * sub)
    tm, th = tm_sel, th_sel

    Mp = _round_up(M, tm)
    n_row = Mp // tm

    # --- zero padding (contributes exactly zero to the result) --------------
    # Weights are cast to bf16 for the MXU (halves weight HBM traffic).
    # TODO(synk): pre-pad / pre-cast weights once at param init in production.
    xp = _pad_to(x2, (Mp, Cp))
    w1p = _pad_to(w1.astype(jnp.bfloat16), (Cp, Hp))
    w2p = _pad_to(w2.astype(jnp.bfloat16), (Hp, Cp))
    b1p = _pad_to(b1.astype(jnp.float32), (Hp,)).reshape(1, Hp)
    b2p = _pad_to(b2.astype(jnp.float32), (Cp,)).reshape(1, Cp)

    # Truthful advisory traffic estimate: x/out once, weights once PER row tile.
    bytes_accessed = int(
        Mp * Cp * x_bytes
        + n_row * (Cp * Hp + Hp * Cp) * w_bytes
        + n_row * (Hp + Cp) * 4
        + Mp * Cp * o_bytes)

    out = pl.pallas_call(
        _mlp_kernel,
        out_shape=jax.ShapeDtypeStruct((Mp, Cp), x.dtype),
        grid_spec=pltpu.PrefetchScalarGridSpec(
            num_scalar_prefetch=0,
            grid=(n_row, Hp // th),
            in_specs=[
                pl.BlockSpec((tm, Cp), lambda i, k: (i, 0)),   # x row tile
                pl.BlockSpec((Cp, th), lambda i, k: (0, k)),   # W1 hidden slice
                pl.BlockSpec((1, th), lambda i, k: (0, k)),    # b1 slice
                pl.BlockSpec((th, Cp), lambda i, k: (k, 0)),   # W2 hidden slice
                pl.BlockSpec((1, Cp), lambda i, k: (0, 0)),    # b2
            ],
            out_specs=pl.BlockSpec((tm, Cp), lambda i, k: (i, 0)),
            scratch_shapes=[pltpu.VMEM((tm, Cp), jnp.float32)],
        ),
        compiler_params=pltpu.CompilerParams(
            dimension_semantics=("parallel", "arbitrary"),
            # 48 MiB: leaves headroom on v7x (64 MiB physical per TC) while
            # raising the 16/32 MiB scoped defaults on v5e/v6e.
            vmem_limit_bytes=48 * 1024 * 1024,
        ),
        cost_estimate=pl.CostEstimate(
            flops=4 * Mp * Cp * Hp,          # two matmuls: 2*M*C*H each
            transcendentals=Mp * Hp,         # erf on the hidden activations
            bytes_accessed=bytes_accessed,
        ),
    )(xp, w1p, b1p, w2p, b2p)

    return out[:M, :C].reshape(orig_shape)


def mlp_reference(x, w1, b1, w2, b2):
    """Pure-JAX reference matching PyTorch semantics (f32 matmuls)."""
    h = jnp.einsum("...c,ch->...h", x, w1) + b1
    h = jax.nn.gelu(h, approximate=False)
    y = jnp.einsum("...h,hc->...c", h, w2) + b2
    return y


if __name__ == "__main__":
    key = jax.random.PRNGKey(0)

    # --- Test 1: toy GPT shapes (exercises the C-padding path) -------------
    B, T, C = 2, 8, 32
    H = 4 * C
    kx, k1, k2, k3, k4, key = jax.random.split(key, 6)
    x = jax.random.normal(kx, (B, T, C), dtype=jnp.float32)
    w1 = jax.random.normal(k1, (C, H), dtype=jnp.float32) * (1.0 / math.sqrt(C))
    b1 = jax.random.normal(k2, (H,), dtype=jnp.float32) * 0.01
    w2 = jax.random.normal(k3, (H, C), dtype=jnp.float32) * (1.0 / math.sqrt(H))
    b2 = jax.random.normal(k4, (C,), dtype=jnp.float32) * 0.01

    y = jax.block_until_ready(mlp_pallas(x, w1, b1, w2, b2))
    y_ref = mlp_reference(x, w1, b1, w2, b2)
    assert y.shape == (B, T, C), y.shape
    # bf16 MXU feeds -> tolerances looser than a pure-f32 comparison.
    assert jnp.allclose(y, y_ref, atol=2e-2, rtol=2e-2), float(
        jnp.max(jnp.abs(y - y_ref)))

    # --- Test 2: multi-step grid (2 row tiles, aligned dims, no padding) ---
    B, T, C = 4, 128, 256
    H = 4 * C
    kx, k1, k2, k3, k4, key = jax.random.split(key, 6)
    x = jax.random.normal(kx, (B, T, C), dtype=jnp.float32)
    w1 = jax.random.normal(k1, (C, H), dtype=jnp.float32) * (1.0 / math.sqrt(C))
    b1 = jax.random.normal(k2, (H,), dtype=jnp.float32) * 0.01
    w2 = jax.random.normal(k3, (H, C), dtype=jnp.float32) * (1.0 / math.sqrt(H))
    b2 = jax.random.normal(k4, (C,), dtype=jnp.float32) * 0.01

    y = jax.block_until_ready(mlp_pallas(x, w1, b1, w2, b2))
    y_ref = mlp_reference(x, w1, b1, w2, b2)
    assert y.shape == (B, T, C), y.shape
    assert jnp.allclose(y, y_ref, atol=3e-2, rtol=3e-2), float(
        jnp.max(jnp.abs(y - y_ref)))

    print("KERNEL_OK")
</pallas_src>

<mosaic_0001>
module attributes {stable_mosaic.version = 11 : i64} {
  func.func @_mlp_kernel(%arg0: i32, %arg1: i32, %arg2: memref<8x128xf32, #tpu.memory_space<vmem>>, %arg3: memref<128x128xbf16, #tpu.memory_space<vmem>>, %arg4: memref<1x128xf32, #tpu.memory_space<vmem>>, %arg5: memref<128x128xbf16, #tpu.memory_space<vmem>>, %arg6: memref<1x128xf32, #tpu.memory_space<vmem>>, %arg7: memref<8x128xf32, #tpu.memory_space<vmem>>, %arg8: memref<8x128xf32, #tpu.memory_space<vmem>>) attributes {dimension_semantics = [#tpu.dimension_semantics<parallel>, #tpu.dimension_semantics<arbitrary>], iteration_bounds = array<i64: 2, 1>, scalar_prefetch = 0 : i64, scratch_operands = 1 : i64, tpu.core_type = #tpu.core_type<tc>, window_params = [{transform_indices = @transform_0, window_bounds = array<i64: 8, 128>}, {transform_indices = @transform_1, window_bounds = array<i64: 128, 128>}, {transform_indices = @transform_2, window_bounds = array<i64: 1, 128>}, {transform_indices = @transform_3, window_bounds = array<i64: 128, 128>}, {pipeline_mode = #tpu.pipeline_mode<synchronous>, transform_indices = @transform_4, window_bounds = array<i64: 1, 128>}, {transform_indices = @transform_5, window_bounds = array<i64: 8, 128>}]} {
    %c0_i32 = arith.constant 0 : i32
    %0 = arith.cmpi eq, %arg1, %c0_i32 : i32
    %1 = arith.extui %0 : i1 to i32
    %c0_i32_0 = arith.constant 0 : i32
    %2 = arith.cmpi ne, %1, %c0_i32_0 : i32
    scf.if %2 {
      %cst_16 = arith.constant 0.000000e+00 : f32
      %27 = vector.broadcast %cst_16 : f32 to vector<8x128xf32>
      %c0_17 = arith.constant 0 : index
      %c0_18 = arith.constant 0 : index
      %28 = vector.load %arg8[%c0_17, %c0_18] : memref<8x128xf32, #tpu.memory_space<vmem>>, vector<8x128xf32>
      tpu.vector_store %arg8[%c0_17, %c0_18], %27 {strides = array<i32>} : memref<8x128xf32, #tpu.memory_space<vmem>>, vector<8x128xf32>,
    } else {
    }
    %c0 = arith.constant 0 : index
    %c0_1 = arith.constant 0 : index
    %3 = vector.load %arg2[%c0, %c0_1] : memref<8x128xf32, #tpu.memory_space<vmem>>, vector<8x128xf32>
    %4 = arith.truncf %3 : vector<8x128xf32> to vector<8x128xbf16>
    %c0_2 = arith.constant 0 : index
    %c0_3 = arith.constant 0 : index
    %5 = vector.load %arg3[%c0_2, %c0_3] : memref<128x128xbf16, #tpu.memory_space<vmem>>, vector<128x128xbf16>
    %cst = arith.constant dense<0.000000e+00> : vector<8x128xf32>
    %6 = tpu.matmul %4, %5, %cst {dimension_numbers = #tpu.dot_dimension_numbers<[1], [0], [0], [1], [0, 0, 1, 1], [], []>} : vector<8x128xbf16>, vector<128x128xbf16>, vector<8x128xf32> -> vector<8x128xf32>
    %c0_4 = arith.constant 0 : index
    %c0_5 = arith.constant 0 : index
    %7 = vector.load %arg4[%c0_4, %c0_5] : memref<1x128xf32, #tpu.memory_space<vmem>>, vector<1x128xf32>
    %8 = vector.broadcast %7 : vector<1x128xf32> to vector<8x128xf32>
    %9 = arith.addf %6, %8 : vector<8x128xf32>
    %cst_6 = arith.constant 5.000000e-01 : f32
    %10 = vector.broadcast %cst_6 : f32 to vector<8x128xf32>
    %11 = arith.mulf %10, %9 : vector<8x128xf32>
    %cst_7 = arith.constant 0.707106769 : f32
    %12 = vector.broadcast %cst_7 : f32 to vector<8x128xf32>
    %13 = arith.mulf %9, %12 : vector<8x128xf32>
    %14 = math.erf %13 : vector<8x128xf32>
    %cst_8 = arith.constant 1.000000e+00 : f32
    %15 = vector.broadcast %cst_8 : f32 to vector<8x128xf32>
    %16 = arith.addf %15, %14 : vector<8x128xf32>
    %17 = arith.mulf %11, %16 : vector<8x128xf32>
    %18 = arith.truncf %17 : vector<8x128xf32> to vector<8x128xbf16>
    %c0_9 = arith.constant 0 : index
    %c0_10 = arith.constant 0 : index
    %19 = vector.load %arg5[%c0_9, %c0_10] : memref<128x128xbf16, #tpu.memory_space<vmem>>, vector<128x128xbf16>
    %cst_11 = arith.constant dense<0.000000e+00> : vector<8x128xf32>
    %20 = tpu.matmul %18, %19, %cst_11 {dimension_numbers = #tpu.dot_dimension_numbers<[1], [0], [0], [1], [0, 0, 1, 1], [], []>} : vector<8x128xbf16>, vector<128x128xbf16>, vector<8x128xf32> -> vector<8x128xf32>
    %c0_i32_12 = arith.constant 0 : i32
    %21 = arith.cmpi ne, %arg1, %c0_i32_12 : i32
    %22 = arith.extui %21 : i1 to i32
    %c0_i32_13 = arith.constant 0 : i32
    %23 = arith.cmpi ne, %22, %c0_i32_13 : i32
    scf.if %23 {
      %c0_16 = arith.constant 0 : index
      %c0_17 = arith.constant 0 : index
      %27 = vector.load %arg8[%c0_16, %c0_17] : memref<8x128xf32, #tpu.memory_space<vmem>>, vector<8x128xf32>
      %28 = arith.addf %27, %20 : vector<8x128xf32>
      %c0_18 = arith.constant 0 : index
      %c0_19 = arith.constant 0 : index
      %29 = vector.load %arg8[%c0_18, %c0_19] : memref<8x128xf32, #tpu.memory_space<vmem>>, vector<8x128xf32>
      tpu.vector_store %arg8[%c0_18, %c0_19], %28 {strides = array<i32>} : memref<8x128xf32, #tpu.memory_space<vmem>>, vector<8x128xf32>,
    } else {
    }
    %c0_i32_14 = arith.constant 0 : i32
    %24 = arith.cmpi eq, %arg1, %c0_i32_14 : i32
    %25 = arith.extui %24 : i1 to i32
    %c0_i32_15 = arith.constant 0 : i32
    %26 = arith.cmpi ne, %25, %c0_i32_15 : i32
    scf.if %26 {
      %c0_16 = arith.constant 0 : index
      %c0_17 = arith.constant 0 : index
      %27 = vector.load %arg8[%c0_16, %c0_17] : memref<8x128xf32, #tpu.memory_space<vmem>>, vector<8x128xf32>
      %28 = arith.addf %27, %20 : vector<8x128xf32>
      %c0_18 = arith.constant 0 : index
      %c0_19 = arith.constant 0 : index
      %29 = vector.load %arg6[%c0_18, %c0_19] : memref<1x128xf32, #tpu.memory_space<vmem>>, vector<1x128xf32>
      %30 = vector.broadcast %29 : vector<1x128xf32> to vector<8x128xf32>
      %31 = arith.addf %28, %30 : vector<8x128xf32>
      %c0_20 = arith.constant 0 : index
      %c0_21 = arith.constant 0 : index
      %32 = vector.load %arg7[%c0_20, %c0_21] : memref<8x128xf32, #tpu.memory_space<vmem>>, vector<8x128xf32>
      tpu.vector_store %arg7[%c0_20, %c0_21], %31 {strides = array<i32>} : memref<8x128xf32, #tpu.memory_space<vmem>>, vector<8x128xf32>,
    } else {
    }
    return
  }
  func.func @transform_0(%arg0: i32, %arg1: i32) -> (i32, i32) {
    %c0_i32 = arith.constant 0 : i32
    %c0_i32_0 = arith.constant 0 : i32
    return %arg0, %c0_i32 : i32, i32
  }
  func.func @transform_1(%arg0: i32, %arg1: i32) -> (i32, i32) {
    %c0_i32 = arith.constant 0 : i32
    %c0_i32_0 = arith.constant 0 : i32
    return %c0_i32, %arg1 : i32, i32
  }
  func.func @transform_2(%arg0: i32, %arg1: i32) -> (i32, i32) {
    %c0_i32 = arith.constant 0 : i32
    %c0_i32_0 = arith.constant 0 : i32
    return %c0_i32, %arg1 : i32, i32
  }
  func.func @transform_3(%arg0: i32, %arg1: i32) -> (i32, i32) {
    %c0_i32 = arith.constant 0 : i32
    %c0_i32_0 = arith.constant 0 : i32
    return %arg1, %c0_i32 : i32, i32
  }
  func.func @transform_4(%arg0: i32, %arg1: i32) -> (i32, i32) {
    %c0_i32 = arith.constant 0 : i32
    %c0_i32_0 = arith.constant 0 : i32
    %c0_i32_1 = arith.constant 0 : i32
    return %c0_i32, %c0_i32_0 : i32, i32
  }
  func.func @transform_5(%arg0: i32, %arg1: i32) -> (i32, i32) {
    %c0_i32 = arith.constant 0 : i32
    %c0_i32_0 = arith.constant 0 : i32
    return %arg0, %c0_i32 : i32, i32
  }
}

</mosaic_0001>

<bundles_post_ra>
// kernel: tpu_custom_call.1
= control target key start
LH: loop header
LB: loop body
LE: loop exit
PB: predicated region body
PF: predicated region fallthrough
CT: control target
= control target key end

     0   :  { %s1290_s0 = inlined_call_operand.hbm [shape: f32[16,128], index: 0, kind: input, shape index: {}]   ;;  %s1291_s1 = inlined_call_operand.hbm [shape: bf16[128,128], index: 1, kind: input, shape index: {}]   ;;  %s1292_s2 = inlined_call_operand.vmem [shape: f32[1,128], index: 2, kind: input, shape index: {}]   ;;  %s1293_s3 = inlined_call_operand.hbm [shape: bf16[128,128], index: 3, kind: input, shape index: {}]   ;;  %s1294_s4 = inlined_call_operand.vmem [shape: f32[1,128], index: 4, kind: input, shape index: {}]   ;;  %s1295_s5 = inlined_call_operand.hbm [shape: f32[16,128], index: 5, kind: output, shape index: {}]  }
   0x1   :  { %1299 = sst [smem:[#allocation13_spill]] %s1291_s1 }
   0x2   :  { %10 = vsyncpa [#allocation4], 0 }
   0x3   :  { %12 = vsyncpa [#allocation4 + $0x1], 0 }
   0x4   :  { %13 = vsyncpa [#allocation7], 0 }
   0x5   :  { %14 = vsyncpa [#allocation5], 0 }
   0x6   :  { %16 = vsyncpa [#allocation5 + $0x1], 0  ;;  %s1091_s18 = smov 0   ;;  %s1093_s19 = smov 0  }
   0x7   :  { %s1095_s20 = smov 0   ;;  %s1097_s21 = smov 0  }
   0x8   :  { %s1099_s22 = smov 0   ;;  %s1101_s23 = smov 0  }
   0x9 LB: > { %s688_s24 = sadd.s32 4294967295, %s1051_s23   ;;  %s689_s25 = sadd.s32 4294967294, %s1051_s23   ;;  %s1051_s23 = sphi %s1101_s23, %s22_s23   ;;  %s1047_s22 = sphi %s1099_s22, %s1317_s22   ;;  %s1043_s21 = sphi %s1097_s21, %s1316_s21   ;;  %s1039_s20 = sphi %s1095_s20, %s1315_s20   ;;  %s1035_s19 = sphi %s1093_s19, %s1314_s19   ;;  %s1031_s18 = sphi %s1091_s18, %s1313_s18  }
   0xa   : > { %p54_p0 = scmp.ne.s32.totalorder %s1035_s19, %s1031_s18  ;;  %p1125_p1 = scmp.eq.s32.totalorder %s688_s24, 0 }
   0xb   : > { %p1129_p2 = scmp.eq.s32.totalorder %s688_s24, 1  ;;  %p183_p3 = scmp.eq.s32.totalorder %s689_s25, 1 }
   0xc   : > { %s1300_s26 = scalar_select %p1125_p1, 1, 0 }
   0xd   : > { %p1135_p4 = por %p1125_p1, %p54_p0  ;;  %p690_p5 = scmp.ge.s32.totalorder %s1051_s23, 1 }
   0xe   : > { %p1140_p6 = por %p183_p3, %p54_p0  ;;  %p190_p7 = scmp.lt.s32.totalorder %s1051_s23, 3 }
   0xf   : > { %s1302_s28 = scalar_select %p1135_p4, 1, 0 }
  0x10   : > { %s1303_s29 = scalar_select %p1140_p6, 1, 0 }
  0x11   : > { %p1145_p8 = pnand %p690_p5, %p190_p7  ;;  %s1053_s6 = smov [#allocation6]  }
  0x12   : > { %s204_s7 = sshll.u32 %s1053_s6, 4  ;;  %s1054_s9 = smov [#allocation8]   ;;  %s205_s7 = int_to_ptr.vmem [resolvable:$true] %s204_s7 }
  0x13   : > { %p794_p9 = pneg %p1145_p8  ;;  %s226_s10 = sshll.u32 %s1054_s9, 4  ;;  %s227_s10 = int_to_ptr.vmem [resolvable:$true] %s226_s10 }
  0x14   : > { %s898_s11 = scalar_lea.vmem %s205_s7, 1024  ;;  %p906_p5 = scmp.lt.s32.totalorder %s205_s7, %s205_s7 }
  0x15   : > { %p1154_p11 = pnand %p794_p9, %p1125_p1  ;;  %p899_p13 = scmp.ne.s32.totalorder %s205_s7, %s898_s11 }
  0x16   : > { %p907_p7 = scmp.lt.s32.totalorder %s898_s11, %s898_s11 }
  0x17   : > { %p889_p12 = pneg %p1154_p11 }
  0x18   : > { %p908_p10 = por %p907_p7, %p906_p5 }
  0x19   : > { %p901_p0 = pnand %p899_p13, %p889_p12 }
  0x1b   : > { %p902_p3 = pneg %p901_p0 }
  0x1d   : > { %p909_p9 = pnand %p908_p10, %p902_p3 }
  0x1f   : > { %912 = shalt.err (!%p909_p9)
}
  0x20   : > { %s1055_s12 = smov 64   ;;  %s1056_s13 = smov 4  }
  0x21   : > { %s1306_s1 = sld [smem:[#allocation13_spill]]  ;;  %s924_s16 = scalar_lea.vmem %s227_s10, 1024 }
  0x22   : > { %p925_p6 = scmp.ne.s32.totalorder %s227_s10, %s924_s16  ;;  %p932_p1 = scmp.lt.s32.totalorder %s227_s10, %s227_s10 }
  0x23   : > { %p933_p4 = scmp.lt.s32.totalorder %s924_s16, %s924_s16 }
  0x24   : > { %p927_p13 = pnand %p925_p6, %p889_p12 }
  0x25   : > { %p934_p5 = por %p933_p4, %p932_p1 }
  0x26   : > { %p928_p0 = pneg %p927_p13 }
  0x27   : > { %797 = dma.hbm_to_vmem [thread:$0]  (!%p1154_p11), %s1306_s1, 1024, %s205_s7, [#allocation7], %s1055_s12, %s1055_s12, %s1056_s13  }
  0x28   : > { %p935_p10 = pnand %p934_p5, %p928_p0 }
  0x2a   : > { %938 = shalt.err (!%p935_p10)
}
  0x2b   : > { %800 = dma.hbm_to_vmem [thread:$0]  (!%p1154_p11), %s1293_s3, 1024, %s227_s10, [#allocation7], %s1055_s12, %s1055_s12, %s1056_s13  }
  0x2c   : > { %s34_s25 = sadd.s32 1, %s1047_s22  ;;  %s41_s6 = sadd.s32 1, %s1039_s20 }
  0x2d   : > { %p36_p1 = scmp.ge.s32.totalorder %s34_s25, 2  ;;  %p48_p4 = scmp.ne.s32.totalorder %s1039_s20, %s1035_s19 }
  0x2e   : > { %p49_p6 = scmp.eq.s32.totalorder %s1051_s23, 0  ;;  %p811_p12 = scmp.lt.s32.totalorder %s1051_s23, 2 }
  0x2f   : > { %s1319_s25 = smov (%p36_p1, %s34_s25), 0  ;;  %p1186_p7 = por %p1129_p2, %p48_p4 }
  0x30   : > { %p50_p3 = por %p49_p6, %p48_p4  ;;  %s38_s8 = ssub.s32 %s1047_s22, %s1319_s25 }
  0x31   : > { %s243_s9 = sand.u32 1, %s1039_s20   ;;  %p39_p9 = scmp.eq.s32.totalorder %s38_s8, 0 }
  0x32   : > { %s695_s10 = sshll.u32 %s243_s9, 3  ;;  %s696_s11 = sshll.u32 %s1047_s22, 7 }
  0x33   : > { %s1195_s12 = scalar_select %p39_p9, %s1039_s20, %s41_s6  }
  0x34   : > { %s252_s15 = scalar_lea.hbm %s1290_s0, %s696_s11  ;;  %s247_s16 = scalar_lea.vmem [#allocation3], %s695_s10 }
  0x35   : > { %s254_s17 = sshll.u32 %s247_s16, 4  ;;  %p1202_p11 = pnand %p811_p12, %p50_p3  ;;  %s255_s17 = int_to_ptr.vmem [resolvable:$true] %s254_s17 }
  0x36   : > { %s244_s24 = scalar_lea.sflag [#allocation4], %s243_s9  ;;  %s952_s8 = scalar_lea.vmem %s255_s17, 128 }
  0x37   : > { %p941_p2 = pneg %p1202_p11  ;;  %p953_p13 = scmp.ne.s32.totalorder %s255_s17, %s952_s8 }
  0x38   : > { %s1057_s6 = smov [#allocation3]  }
  0x39   : > { %p955_p0 = pnand %p953_p13, %p941_p2  ;;  %s957_s1 = sshll.u32 %s1057_s6, 4  ;;  %s958_s1 = int_to_ptr.vmem [resolvable:$false] %s957_s1 }
  0x3a   : > { %s959_s11 = scalar_lea.vmem %s958_s1, 256  ;;  %p960_p10 = scmp.lt.s32.totalorder %s255_s17, %s958_s1 }
  0x3b   : > { %p956_p5 = pneg %p955_p0  ;;  %p961_p1 = scmp.lt.s32.totalorder %s959_s11, %s952_s8 }
  0x3d   : > { %p962_p4 = por %p961_p1, %p960_p10 }
  0x3f   : > { %p963_p6 = pnand %p962_p4, %p956_p5 }
  0x41   : > { %966 = shalt.err (!%p963_p6)
}
  0x42   : > { %804 = dma.hbm_to_vmem [thread:$0]  (!%p1202_p11), %s252_s15, 128, %s255_s17, %s244_s24  }
  0x43   : > { %263 = sbr.rel (%p1145_p8) target bundleno = 536 (0x218), region = 40  ;;  %s1213_s9 = sand.u32 (!%p1145_p8), 1, %s1035_s19  }
  0x44   : > { %s698_s10 = sshll.u32 (!%p1145_p8), %s1213_s9, 3  ;;  %s266_s13 = scalar_lea.sflag (!%p1145_p8), [#allocation4], %s1213_s9 }
  0x45   : > { %s1219_s1 = scalar_lea.vmem (!%p1145_p8), [#allocation3], %s698_s10  ;;  %p1309_p12 = scmp.ne.s32.totalorder (!%p1145_p8), %s1302_s28, 0 }
  0x48   : > { %1018 = dma.done.wait (%p1309_p12), %s266_s13, 128  }
  0x49   : > { %1020 = vsyncadd (%p1309_p12), %s266_s13, 4294967168  ;;  %p1310_p3 = scmp.ne.s32.totalorder %s1300_s26, 0 }
  0x4b   : > { %1022 = dma.done.wait (%p1310_p3), [#allocation7], 2048  }
  0x4c   : > { %1024 = vsyncadd (%p1310_p3), [#allocation7], 4294965248  ;;  %v1058_v0 = vmov 0.0   ;;  %vm1059_vm0 = vmmov 0   ;;  %v869_v1 = vld [vmem:[#allocation6 + $0x38] sm:$0xff]   ;;  %v870_v2 = vld [vmem:[#allocation6 + $0x30] sm:$0xff]  }
  0x4d   : > { %742 = vmatprep.subr.bf16.mxu0 %v1058_v0  ;;  %758 = vmatprep.mubr.msk.bf16.mxu0 %vm1059_vm0, %v1058_v0  ;;  %v871_v3 = vld [vmem:[#allocation6 + $0x28] sm:$0xff]   ;;  %v877_v4 = vld [vmem:[#allocation8 + $0x38] sm:$0xff]   ;;  %v872_v5 = vld [vmem:[#allocation6 + $0x20] sm:$0xff]   ;;  %s721_s15 = sshll.u32 %s1043_s21, 7  ;;  %s306_s16 = scalar_lea.vmem [#allocation9], %s698_s10 }
  0x4e   : > { %762 = vmatprep.subr.bf16.mxu1 %v1058_v0  ;;  %778 = vmatprep.mubr.msk.bf16.mxu1 %vm1059_vm0, %v1058_v0  ;;  %v878_v6 = vld [vmem:[#allocation8 + $0x30] sm:$0xff]   ;;  %v873_v7 = vld [vmem:[#allocation6 + $0x18] sm:$0xff]   ;;  %v875_v9 = vld [vmem:[#allocation6 + $0x8] sm:$0xff]   ;;  %s575_s17 = sshll.u32 %s306_s16, 4  ;;  %s1242_s8 = scalar_lea.hbm %s1295_s5, %s721_s15  ;;  %s1244_s17 = int_to_ptr.vmem [resolvable:$true] %s575_s17 }
  0x4f   : > { %743 = vmatpush3.bf16.msra.mxu0 %v869_v1  ;;  %763 = vmatpush3.bf16.msra.mxu1 %v877_v4  ;;  %v874_v8 = vld [vmem:[#allocation6 + $0x10] sm:$0xff]   ;;  %v876_v10 = vld [vmem:[#allocation6] sm:$0xff]   ;;  %v879_v13 = vld [vmem:[#allocation8 + $0x28] sm:$0xff]   ;;  %s562_s6 = scalar_lea.sflag [#allocation5], %s1213_s9  ;;  %s967_s21 = scalar_lea.vmem %s1244_s17, 128 }
  0x50   : > { %744 = vmatprep.subr.bf16.mxu0 %v1058_v0  ;;  %764 = vmatprep.subr.bf16.mxu1 %v1058_v0  ;;  %v317_v11 = vld [vmem:[%s1219_s1] sm:$0xff]  ;;  %v880_v14 = vld [vmem:[#allocation8 + $0x20] sm:$0xff]   ;;  %v883_v17 = vld [vmem:[#allocation8 + $0x8] sm:$0xff]   ;;  %p968_p8 = scmp.ne.s32.totalorder %s1244_s17, %s967_s21  ;;  %s1060_s11 = smov [#allocation9]  }
  0x51   : > { %v318_v12 = vpack.c.bf16 %v317_v11, %v317_v11  ;;  %v881_v15 = vld [vmem:[#allocation8 + $0x18] sm:$0xff]   ;;  %v882_v16 = vld [vmem:[#allocation8 + $0x10] sm:$0xff]   ;;  %v884_v18 = vld [vmem:[#allocation8] sm:$0xff]   ;;  %s971_s10 = sshll.u32 %s1060_s11, 4  ;;  %s972_s10 = int_to_ptr.vmem [resolvable:$false] %s971_s10 }
  0x52   : > { %v702_v19 = vld [vmem:[%s1292_s2] ss:$0 sm:$0xff]  ;;  %p969_p9 = pnand %p968_p8, %p1186_p7  ;;  %s973_s13 = scalar_lea.vmem %s972_s10, 256 }
  0x53   : > { %745 = vmatpush3.bf16.msra.mxu0 %v870_v2  ;;  %765 = vmatpush3.bf16.msra.mxu1 %v878_v6  ;;  %v719_v31 = vld [vmem:[%s1294_s4] ss:$0 sm:$0xff]  ;;  %p974_p2 = scmp.lt.s32.totalorder %s1244_s17, %s972_s10  ;;  %p975_p13 = scmp.lt.s32.totalorder %s973_s13, %s967_s21 }
  0x54   : > { %746 = vmatprep.subr.bf16.mxu0 %v1058_v0  ;;  %766 = vmatprep.subr.bf16.mxu1 %v1058_v0  ;;  %p970_p11 = pneg %p969_p9 }
  0x55   : > { %p976_p0 = por %p975_p13, %p974_p2 }
  0x57   : > { %747 = vmatpush3.bf16.msra.mxu0 %v871_v3  ;;  %767 = vmatpush3.bf16.msra.mxu1 %v879_v13  ;;  %p977_p5 = pnand %p976_p0, %p970_p11 }
  0x58   : > { %748 = vmatprep.subr.bf16.mxu0 %v1058_v0  ;;  %768 = vmatprep.subr.bf16.mxu1 %v1058_v0 }
  0x5b   : > { %749 = vmatpush3.bf16.msra.mxu0 %v872_v5  ;;  %769 = vmatpush3.bf16.msra.mxu1 %v880_v14 }
  0x5c   : > { %750 = vmatprep.subr.bf16.mxu0 %v1058_v0  ;;  %770 = vmatprep.subr.bf16.mxu1 %v1058_v0 }
  0x5f   : > { %751 = vmatpush3.bf16.msra.mxu0 %v873_v7  ;;  %771 = vmatpush3.bf16.msra.mxu1 %v881_v15 }
  0x60   : > { %752 = vmatprep.subr.bf16.mxu0 %v1058_v0  ;;  %772 = vmatprep.subr.bf16.mxu1 %v1058_v0 }
  0x63   : > { %753 = vmatpush3.bf16.msra.mxu0 %v874_v8  ;;  %773 = vmatpush3.bf16.msra.mxu1 %v882_v16 }
  0x64   : > { %754 = vmatprep.subr.bf16.mxu0 %v1058_v0  ;;  %774 = vmatprep.subr.bf16.mxu1 %v1058_v0 }
  0x67   : > { %755 = vmatpush3.bf16.msra.mxu0 %v875_v9  ;;  %775 = vmatpush3.bf16.msra.mxu1 %v883_v17 }
  0x68   : > { %756 = vmatprep.subr.bf16.mxu0 %v1058_v0  ;;  %776 = vmatprep.subr.bf16.mxu1 %v1058_v0 }
  0x6b   : > { %757 = vmatpush3.bf16.msra.mxu0 %v876_v10  ;;  %777 = vmatpush3.bf16.msra.mxu1 %v884_v18 }
  0x6e   : > { %759 = vmatmul.mubr.bf16.vlgmr.msra.gmra.mxu0 %v318_v12 }
 0x12e   : > { %v424_v20 = vpop.f32.mrf.mxu0 }
 0x12f   : > { %v425_v21 = vadd.f32 %v702_v19, %v424_v20 }
 0x130   : > { %v760_v22 = vpop.f32.mrf.mxu0 }
 0x131   : > { %v431_v23 = vmul.f32 0.70710677, %v425_v21  ;;  %v430_v27 = vmul.f32 0.5, %v425_v21 }
 0x132   : > { %v427_v24 = vpop.f32.mrf.mxu0 }
 0x133   : > { %885 = verf.f32 %v431_v23 }
 0x134   : > { %v761_v25 = vpop.f32.mrf.mxu0 }
 0x140   : > { %v886_v26 = vpop.eup %885 }
 0x141   : > { %v433_v28 = vadd.f32 1.0, %v886_v26 }
 0x143   : > { %v434_v29 = vmul.f32 %v433_v28, %v430_v27 }
 0x145   : > { %v435_v30 = vpack.c.bf16 %v434_v29, %v434_v29 }
 0x147   : > { %779 = vmatmul.mubr.bf16.vlgmr.msra.gmra.mxu1 %v435_v30 }
 0x207   : > { %v534_v32 = vpop.f32.mrf.mxu1 }
 0x208   : > { %v559_v33 = vadd.f32 %v719_v31, %v534_v32 }
 0x209   : > { %v780_v34 = vpop.f32.mrf.mxu1 }
 0x20a   : > { %560 = vst [vmem:[%s306_s16] sm:$0xff] %v559_v33 }
 0x20b   : > { %v537_v35 = vpop.f32.mrf.mxu1 }
 0x20c   : > { %980 = shalt.err (!%p977_p5)
}
 0x20d   : > { %s981_s1 = scalar_lea.hbm %s1242_s8, 128  ;;  %s985_s28 = scalar_lea.hbm %s1295_s5, 256 }
 0x20e   : > { %p982_p10 = scmp.ne.s32.totalorder %s1242_s8, %s981_s1  ;;  %p986_p6 = scmp.lt.s32.totalorder %s1242_s8, %s1295_s5 }
 0x20f   : > { %p987_p12 = scmp.lt.s32.totalorder %s985_s28, %s981_s1 }
 0x210   : > { %p983_p1 = pnand %p982_p10, %p1186_p7 }
 0x211   : > { %p988_p3 = por %p987_p12, %p986_p6 }
 0x212   : > { %p984_p4 = pneg %p983_p1 }
 0x214   : > { %p989_p8 = pnand %p988_p3, %p984_p4 }
 0x216   : > { %992 = shalt.err (!%p989_p8)
}
 0x217   : > { %792 = dma.vmem_to_hbm [thread:$0]  (%p1186_p7), %s1244_s17, 128, %s1242_s8, %s562_s6   ;;  %v781_v36 = vpop.f32.mrf.mxu1 }
 0x218 PF: > { %s587_s15 = sand.u32 1, %s1031_s18   ;;  %p1311_p9 = scmp.ne.s32.totalorder %s1303_s29, 0 }
 0x219   : > { %p1312_p11 = scmp.ge.s32.totalorder %s1051_s23, 2  ;;  %s588_s16 = scalar_lea.sflag [#allocation5], %s587_s15 }
 0x21b   : > { %p806_p2 = pnand %p1312_p11, %p1311_p9 }
 0x21d   : > { %p807_p13 = pneg %p806_p2 }
 0x21f   : > { %1026 = dma.done.wait (%p807_p13), %s588_s16, 128  }
 0x220   : > { %1028 = vsyncadd (%p807_p13), %s588_s16, 4294967168  ;;  %s22_s23 = sadd.s32 1, %s1051_s23   ;;  %s1313_s18 = smov %s1035_s19 }
 0x221   : > { %p19_p0 = scmp.ge.s32.totalorder %s22_s23, 4   ;;  %s1314_s19 = smov %s1039_s20 }
 0x222   : > { %s1315_s20 = smov %s1195_s12  ;;  %s1316_s21 = smov %s1047_s22 }
 0x223   : > { %s1317_s22 = smov %s1319_s25  ;;  %21 = sbr.rel (!%p19_p0) target bundleno = 9 (0x9), region = 110 }
 0x228   :  { %593 = vsyncpa [#allocation4], 1 }
 0x229   :  { %595 = vsyncpa [#allocation4 + $0x1], 1 }
 0x22a   :  { %596 = vsyncpa [#allocation7], 1 }
 0x22b   :  { %597 = vsyncpa [#allocation5], 1 }
 0x22c   :  { %599 = vsyncpa [#allocation5 + $0x1], 1 }

</bundles_post_ra>
